<compile_context>
chip_gen: v7x
topology: tpu7x:2x2x1
jax: 0.10.0
libtpu: 0.0.40
codegen_flags: <defaults>
</compile_context>

<pallas_src>
import functools

import jax
import jax.numpy as jnp
from jax import lax
from jax.experimental import pallas as pl
from jax.experimental.pallas import tpu as pltpu


def _round_up(n, m):
    return (n + m - 1) // m * m


def _choose_tm(batch, tile_m_max):
    """Batch tile: tm == B (single step) for small B, otherwise a multiple of 128
    chosen so the grid has >= 2 steps (v7x megacore) and <= tile_m_max rows."""
    if batch <= 256:
        return batch                       # block dims equal full array dims -> legal
    tm = _round_up(pl.cdiv(batch, 2), 128)  # >= 2 grid steps
    return min(tm, tile_m_max)


def _mlp_kernel(x_ref,
                w1_ref, b1_ref,
                w2_ref, b2_ref,
                w3_ref, b3_ref,
                w4t_ref, b4t_ref,
                o_ref):
    """Fused forward.  BN already folded into (w1, b1)/(w2, b2); biases are f32;
    matmul operands are bf16 with f32 accumulation on the MXU.  Output is written
    transposed: o_ref is (OUT_PAD, tm) so the writeback is lane-dense over batch."""
    op_dtype = w1_ref.dtype

    # fc1 (+ folded bn1) + relu        (dropout1: identity in eval mode)
    x = x_ref[...].astype(op_dtype)                     # (tm, K) f32 -> bf16, VPU
    h = jnp.dot(x, w1_ref[...], preferred_element_type=jnp.float32) + b1_ref[...]
    h = jnp.maximum(h, 0.0)

    # fc2 (+ folded bn2) + relu        (dropout2: identity in eval mode)
    h = jnp.dot(h.astype(op_dtype), w2_ref[...],
                preferred_element_type=jnp.float32) + b2_ref[...]
    h = jnp.maximum(h, 0.0)

    # fc3 + relu
    h = jnp.dot(h.astype(op_dtype), w3_ref[...],
                preferred_element_type=jnp.float32) + b3_ref[...]
    h = jnp.maximum(h, 0.0)

    # fc4, computed directly in transposed form:
    #   out_t[o, m] = sum_k w4t[o, k] * h[m, k]   (NT contraction, no explicit transpose)
    out_t = lax.dot_general(
        w4t_ref[...], h.astype(op_dtype),
        dimension_numbers=(((1,), (1,)), ((), ())),
        preferred_element_type=jnp.float32) + b4t_ref[...]
    o_ref[...] = out_t.astype(o_ref.dtype)


def prepare_params(params, *, operand_dtype=jnp.bfloat16, eps=1e-5):
    """One-time prep: fold eval-mode BatchNorm1d (running stats) into fc1/fc2 in
    f32, cast weights to the MXU operand dtype, and pre-transpose/pad fc4."""
    s1 = params["bn1_gamma"] / jnp.sqrt(params["bn1_var"] + eps)
    t1 = params["bn1_beta"] - params["bn1_mean"] * s1
    s2 = params["bn2_gamma"] / jnp.sqrt(params["bn2_var"] + eps)
    t2 = params["bn2_beta"] - params["bn2_mean"] * s2

    w1f = params["w1"] * s1[None, :]
    b1f = params["b1"] * s1 + t1
    w2f = params["w2"] * s2[None, :]
    b2f = params["b2"] * s2 + t2

    w4, b4 = params["w4"], params["b4"]
    out_dim = w4.shape[1]
    out_pad = _round_up(out_dim, 8)          # sublane-pad transposed output rows

    w4t = jnp.pad(w4.T, ((0, out_pad - out_dim), (0, 0)))      # (out_pad, h3)
    b4t = jnp.pad(b4, (0, out_pad - out_dim)).reshape(out_pad, 1)

    return dict(
        w1=w1f.astype(operand_dtype), b1=b1f.reshape(1, -1).astype(jnp.float32),
        w2=w2f.astype(operand_dtype), b2=b2f.reshape(1, -1).astype(jnp.float32),
        w3=params["w3"].astype(operand_dtype),
        b3=params["b3"].reshape(1, -1).astype(jnp.float32),
        w4t=w4t.astype(operand_dtype), b4t=b4t.astype(jnp.float32),
    )


@functools.partial(jax.jit, static_argnames=("out_dim", "tile_m_max"))
def value_only_nn_forward(x, prep, *, out_dim=6, tile_m_max=1024):
    """x: (B, input_size) float32, prep: output of prepare_params.
    Returns (B, out_dim) float32."""
    B, K = x.shape
    w1, b1 = prep["w1"], prep["b1"]
    w2, b2 = prep["w2"], prep["b2"]
    w3, b3 = prep["w3"], prep["b3"]
    w4t, b4t = prep["w4t"], prep["b4t"]

    h1 = w1.shape[1]
    h2 = w2.shape[1]
    h3 = w3.shape[1]
    out_pad = w4t.shape[0]

    tm = _choose_tm(B, tile_m_max)
    grid = (pl.cdiv(B, tm),)

    def resident(shape):
        # Whole array, same block index every grid step -> stays resident in VMEM.
        return pl.BlockSpec(shape, lambda i: (0, 0))

    in_specs = [
        pl.BlockSpec((tm, K), lambda i: (i, 0)),        # x: tiled over batch, K un-padded
        resident((K, h1)), resident((1, h1)),           # fc1 (+bn1 folded)
        resident((h1, h2)), resident((1, h2)),          # fc2 (+bn2 folded)
        resident((h2, h3)), resident((1, h3)),          # fc3
        resident((out_pad, h3)), resident((out_pad, 1)),  # fc4 (pre-transposed)
    ]
    # Transposed output: (out_pad, B), lane-dense over the batch dimension.
    out_specs = pl.BlockSpec((out_pad, tm), lambda i: (0, i))

    out_t = pl.pallas_call(
        _mlp_kernel,
        out_shape=jax.ShapeDtypeStruct((out_pad, B), jnp.float32),
        grid=grid,
        in_specs=in_specs,
        out_specs=out_specs,
        compiler_params=pltpu.CompilerParams(
            dimension_semantics=("parallel",)),
    )(x, w1, b1, w2, b2, w3, b3, w4t, b4t)

    return out_t[:out_dim, :].T               # tiny (6, B) -> (B, 6)


def init_params(key, input_size, hidden_size=256):
    h1 = hidden_size
    h2 = hidden_size // 2
    h3 = hidden_size // 4
    out = 6
    ks = jax.random.split(key, 12)

    def lin(k, fan_in, fan_out):
        kw, kb = jax.random.split(k)
        w = jax.random.normal(kw, (fan_in, fan_out), jnp.float32) / jnp.sqrt(fan_in)
        b = jax.random.normal(kb, (fan_out,), jnp.float32) * 0.01
        return w, b

    w1, b1 = lin(ks[0], input_size, h1)
    w2, b2 = lin(ks[1], h1, h2)
    w3, b3 = lin(ks[2], h2, h3)
    w4, b4 = lin(ks[3], h3, out)

    return dict(
        w1=w1, b1=b1, w2=w2, b2=b2, w3=w3, b3=b3, w4=w4, b4=b4,
        # Nontrivial (but deterministic) BN affine params + running stats.
        bn1_gamma=1.0 + 0.1 * jax.random.normal(ks[4], (h1,), jnp.float32),
        bn1_beta=0.1 * jax.random.normal(ks[5], (h1,), jnp.float32),
        bn1_mean=0.05 * jax.random.normal(ks[6], (h1,), jnp.float32),
        bn1_var=jax.random.uniform(ks[7], (h1,), jnp.float32, 0.5, 1.5),
        bn2_gamma=1.0 + 0.1 * jax.random.normal(ks[8], (h2,), jnp.float32),
        bn2_beta=0.1 * jax.random.normal(ks[9], (h2,), jnp.float32),
        bn2_mean=0.05 * jax.random.normal(ks[10], (h2,), jnp.float32),
        bn2_var=jax.random.uniform(ks[11], (h2,), jnp.float32, 0.5, 1.5),
    )


def reference_forward_f32(x, params):
    """Plain-JAX f32 reference mirroring the PyTorch eval-mode forward."""
    eps = 1e-5
    h = x @ params["w1"] + params["b1"]
    h = (h - params["bn1_mean"]) / jnp.sqrt(params["bn1_var"] + eps)
    h = h * params["bn1_gamma"] + params["bn1_beta"]
    h = jnp.maximum(h, 0.0)
    h = h @ params["w2"] + params["b2"]
    h = (h - params["bn2_mean"]) / jnp.sqrt(params["bn2_var"] + eps)
    h = h * params["bn2_gamma"] + params["bn2_beta"]
    h = jnp.maximum(h, 0.0)
    h = jnp.maximum(h @ params["w3"] + params["b3"], 0.0)
    return h @ params["w4"] + params["b4"]


def reference_forward_matched(x, params, operand_dtype=jnp.bfloat16):
    """Plain-JAX reference with the same BN fold + bf16 operands / f32 accumulate."""
    eps = 1e-5
    s1 = params["bn1_gamma"] / jnp.sqrt(params["bn1_var"] + eps)
    t1 = params["bn1_beta"] - params["bn1_mean"] * s1
    s2 = params["bn2_gamma"] / jnp.sqrt(params["bn2_var"] + eps)
    t2 = params["bn2_beta"] - params["bn2_mean"] * s2
    w1f, b1f = params["w1"] * s1[None, :], params["b1"] * s1 + t1
    w2f, b2f = params["w2"] * s2[None, :], params["b2"] * s2 + t2

    dot = lambda a, b: jnp.dot(a.astype(operand_dtype), b.astype(operand_dtype),
                               preferred_element_type=jnp.float32)
    h = jnp.maximum(dot(x, w1f) + b1f, 0.0)
    h = jnp.maximum(dot(h, w2f) + b2f, 0.0)
    h = jnp.maximum(dot(h, params["w3"]) + params["b3"], 0.0)
    return dot(h, params["w4"]) + params["b4"]


if __name__ == "__main__":
    key = jax.random.PRNGKey(0)
    k_x, k_p, k_x2 = jax.random.split(key, 3)

    batch = 8
    input_size = 32
    hidden_size = 256  # module default -> layers 256, 128, 64, 6

    x = jax.random.normal(k_x, (batch, input_size), jnp.float32)
    params = init_params(k_p, input_size, hidden_size)
    prep = prepare_params(params)   # one-time BN fold + cast (outside per-call path)

    out = jax.block_until_ready(value_only_nn_forward(x, prep))
    assert out.shape == (batch, 6)

    ref_matched = reference_forward_matched(x, params)
    assert jnp.allclose(out, ref_matched, atol=1e-2, rtol=1e-2), \
        "mismatch vs bf16-operand reference"

    ref_f32 = reference_forward_f32(x, params)
    assert jnp.allclose(out, ref_f32, atol=5e-2, rtol=5e-2), \
        "mismatch vs f32 reference"

    # Exercise the multi-step grid + ragged-last-block path (B not a tile multiple).
    x2 = jax.random.normal(k_x2, (300, input_size), jnp.float32)
    out2 = jax.block_until_ready(value_only_nn_forward(x2, prep))
    assert out2.shape == (300, 6)
    assert jnp.allclose(out2, reference_forward_matched(x2, params),
                        atol=1e-2, rtol=1e-2), "mismatch on multi-step grid path"

    print("KERNEL_OK")
</pallas_src>

<mosaic_0001>
module attributes {stable_mosaic.version = 11 : i64} {
  func.func @_mlp_kernel(%arg0: i32, %arg1: memref<8x32xf32, #tpu.memory_space<vmem>>, %arg2: memref<32x256xbf16, #tpu.memory_space<vmem>>, %arg3: memref<1x256xf32, #tpu.memory_space<vmem>>, %arg4: memref<256x128xbf16, #tpu.memory_space<vmem>>, %arg5: memref<1x128xf32, #tpu.memory_space<vmem>>, %arg6: memref<128x64xbf16, #tpu.memory_space<vmem>>, %arg7: memref<1x64xf32, #tpu.memory_space<vmem>>, %arg8: memref<8x64xbf16, #tpu.memory_space<vmem>>, %arg9: memref<8x1xf32, #tpu.memory_space<vmem>>, %arg10: memref<8x8xf32, #tpu.memory_space<vmem>>) attributes {dimension_semantics = [#tpu.dimension_semantics<parallel>], iteration_bounds = array<i64: 1>, scalar_prefetch = 0 : i64, scratch_operands = 0 : i64, tpu.core_type = #tpu.core_type<tc>, window_params = [{transform_indices = @transform_0, window_bounds = array<i64: 8, 32>}, {pipeline_mode = #tpu.pipeline_mode<synchronous>, transform_indices = @transform_1, window_bounds = array<i64: 32, 256>}, {pipeline_mode = #tpu.pipeline_mode<synchronous>, transform_indices = @transform_2, window_bounds = array<i64: 1, 256>}, {pipeline_mode = #tpu.pipeline_mode<synchronous>, transform_indices = @transform_3, window_bounds = array<i64: 256, 128>}, {pipeline_mode = #tpu.pipeline_mode<synchronous>, transform_indices = @transform_4, window_bounds = array<i64: 1, 128>}, {pipeline_mode = #tpu.pipeline_mode<synchronous>, transform_indices = @transform_5, window_bounds = array<i64: 128, 64>}, {pipeline_mode = #tpu.pipeline_mode<synchronous>, transform_indices = @transform_6, window_bounds = array<i64: 1, 64>}, {pipeline_mode = #tpu.pipeline_mode<synchronous>, transform_indices = @transform_7, window_bounds = array<i64: 8, 64>}, {pipeline_mode = #tpu.pipeline_mode<synchronous>, transform_indices = @transform_8, window_bounds = array<i64: 8, 1>}, {transform_indices = @transform_9, window_bounds = array<i64: 8, 8>}]} {
    %c0 = arith.constant 0 : index
    %c0_0 = arith.constant 0 : index
    %0 = vector.load %arg1[%c0, %c0_0] : memref<8x32xf32, #tpu.memory_space<vmem>>, vector<8x32xf32>
    %1 = arith.truncf %0 : vector<8x32xf32> to vector<8x32xbf16>
    %c0_1 = arith.constant 0 : index
    %c0_2 = arith.constant 0 : index
    %2 = vector.load %arg2[%c0_1, %c0_2] : memref<32x256xbf16, #tpu.memory_space<vmem>>, vector<32x256xbf16>
    %cst = arith.constant dense<0.000000e+00> : vector<8x256xf32>
    %3 = tpu.matmul %1, %2, %cst {dimension_numbers = #tpu.dot_dimension_numbers<[1], [0], [0], [1], [0, 0, 1, 1], [], []>} : vector<8x32xbf16>, vector<32x256xbf16>, vector<8x256xf32> -> vector<8x256xf32>
    %c0_3 = arith.constant 0 : index
    %c0_4 = arith.constant 0 : index
    %4 = vector.load %arg3[%c0_3, %c0_4] : memref<1x256xf32, #tpu.memory_space<vmem>>, vector<1x256xf32>
    %5 = vector.broadcast %4 : vector<1x256xf32> to vector<8x256xf32>
    %6 = arith.addf %3, %5 : vector<8x256xf32>
    %cst_5 = arith.constant 0.000000e+00 : f32
    %7 = vector.broadcast %cst_5 : f32 to vector<8x256xf32>
    %8 = arith.maximumf %6, %7 : vector<8x256xf32>
    %9 = arith.truncf %8 : vector<8x256xf32> to vector<8x256xbf16>
    %c0_6 = arith.constant 0 : index
    %c0_7 = arith.constant 0 : index
    %10 = vector.load %arg4[%c0_6, %c0_7] : memref<256x128xbf16, #tpu.memory_space<vmem>>, vector<256x128xbf16>
    %cst_8 = arith.constant dense<0.000000e+00> : vector<8x128xf32>
    %11 = tpu.matmul %9, %10, %cst_8 {dimension_numbers = #tpu.dot_dimension_numbers<[1], [0], [0], [1], [0, 0, 1, 1], [], []>} : vector<8x256xbf16>, vector<256x128xbf16>, vector<8x128xf32> -> vector<8x128xf32>
    %c0_9 = arith.constant 0 : index
    %c0_10 = arith.constant 0 : index
    %12 = vector.load %arg5[%c0_9, %c0_10] : memref<1x128xf32, #tpu.memory_space<vmem>>, vector<1x128xf32>
    %13 = vector.broadcast %12 : vector<1x128xf32> to vector<8x128xf32>
    %14 = arith.addf %11, %13 : vector<8x128xf32>
    %cst_11 = arith.constant 0.000000e+00 : f32
    %15 = vector.broadcast %cst_11 : f32 to vector<8x128xf32>
    %16 = arith.maximumf %14, %15 : vector<8x128xf32>
    %17 = arith.truncf %16 : vector<8x128xf32> to vector<8x128xbf16>
    %c0_12 = arith.constant 0 : index
    %c0_13 = arith.constant 0 : index
    %18 = vector.load %arg6[%c0_12, %c0_13] : memref<128x64xbf16, #tpu.memory_space<vmem>>, vector<128x64xbf16>
    %cst_14 = arith.constant dense<0.000000e+00> : vector<8x64xf32>
    %19 = tpu.matmul %17, %18, %cst_14 {dimension_numbers = #tpu.dot_dimension_numbers<[1], [0], [0], [1], [0, 0, 1, 1], [], []>} : vector<8x128xbf16>, vector<128x64xbf16>, vector<8x64xf32> -> vector<8x64xf32>
    %c0_15 = arith.constant 0 : index
    %c0_16 = arith.constant 0 : index
    %20 = vector.load %arg7[%c0_15, %c0_16] : memref<1x64xf32, #tpu.memory_space<vmem>>, vector<1x64xf32>
    %21 = vector.broadcast %20 : vector<1x64xf32> to vector<8x64xf32>
    %22 = arith.addf %19, %21 : vector<8x64xf32>
    %cst_17 = arith.constant 0.000000e+00 : f32
    %23 = vector.broadcast %cst_17 : f32 to vector<8x64xf32>
    %24 = arith.maximumf %22, %23 : vector<8x64xf32>
    %c0_18 = arith.constant 0 : index
    %c0_19 = arith.constant 0 : index
    %25 = vector.load %arg8[%c0_18, %c0_19] : memref<8x64xbf16, #tpu.memory_space<vmem>>, vector<8x64xbf16>
    %26 = arith.truncf %24 : vector<8x64xf32> to vector<8x64xbf16>
    %cst_20 = arith.constant dense<0.000000e+00> : vector<8x8xf32>
    %27 = tpu.matmul %25, %26, %cst_20 {dimension_numbers = #tpu.dot_dimension_numbers<[1], [1], [0], [0], [0, 0, 1, 0], [], []>} : vector<8x64xbf16>, vector<8x64xbf16>, vector<8x8xf32> -> vector<8x8xf32>
    %c0_21 = arith.constant 0 : index
    %c0_22 = arith.constant 0 : index
    %28 = vector.load %arg9[%c0_21, %c0_22] : memref<8x1xf32, #tpu.memory_space<vmem>>, vector<8x1xf32>
    %29 = vector.broadcast %28 : vector<8x1xf32> to vector<8x8xf32>
    %30 = arith.addf %27, %29 : vector<8x8xf32>
    %c0_23 = arith.constant 0 : index
    %c0_24 = arith.constant 0 : index
    %31 = vector.load %arg10[%c0_23, %c0_24] : memref<8x8xf32, #tpu.memory_space<vmem>>, vector<8x8xf32>
    tpu.vector_store %arg10[%c0_23, %c0_24], %30 {strides = array<i32>} : memref<8x8xf32, #tpu.memory_space<vmem>>, vector<8x8xf32>,
    return
  }
  func.func @transform_0(%arg0: i32) -> (i32, i32) {
    %c0_i32 = arith.constant 0 : i32
    %c0_i32_0 = arith.constant 0 : i32
    return %arg0, %c0_i32 : i32, i32
  }
  func.func @transform_1(%arg0: i32) -> (i32, i32) {
    %c0_i32 = arith.constant 0 : i32
    %c0_i32_0 = arith.constant 0 : i32
    %c0_i32_1 = arith.constant 0 : i32
    return %c0_i32, %c0_i32_0 : i32, i32
  }
  func.func @transform_2(%arg0: i32) -> (i32, i32) {
    %c0_i32 = arith.constant 0 : i32
    %c0_i32_0 = arith.constant 0 : i32
    %c0_i32_1 = arith.constant 0 : i32
    return %c0_i32, %c0_i32_0 : i32, i32
  }
  func.func @transform_3(%arg0: i32) -> (i32, i32) {
    %c0_i32 = arith.constant 0 : i32
    %c0_i32_0 = arith.constant 0 : i32
    %c0_i32_1 = arith.constant 0 : i32
    return %c0_i32, %c0_i32_0 : i32, i32
  }
  func.func @transform_4(%arg0: i32) -> (i32, i32) {
    %c0_i32 = arith.constant 0 : i32
    %c0_i32_0 = arith.constant 0 : i32
    %c0_i32_1 = arith.constant 0 : i32
    return %c0_i32, %c0_i32_0 : i32, i32
  }
  func.func @transform_5(%arg0: i32) -> (i32, i32) {
    %c0_i32 = arith.constant 0 : i32
    %c0_i32_0 = arith.constant 0 : i32
    %c0_i32_1 = arith.constant 0 : i32
    return %c0_i32, %c0_i32_0 : i32, i32
  }
  func.func @transform_6(%arg0: i32) -> (i32, i32) {
    %c0_i32 = arith.constant 0 : i32
    %c0_i32_0 = arith.constant 0 : i32
    %c0_i32_1 = arith.constant 0 : i32
    return %c0_i32, %c0_i32_0 : i32, i32
  }
  func.func @transform_7(%arg0: i32) -> (i32, i32) {
    %c0_i32 = arith.constant 0 : i32
    %c0_i32_0 = arith.constant 0 : i32
    %c0_i32_1 = arith.constant 0 : i32
    return %c0_i32, %c0_i32_0 : i32, i32
  }
  func.func @transform_8(%arg0: i32) -> (i32, i32) {
    %c0_i32 = arith.constant 0 : i32
    %c0_i32_0 = arith.constant 0 : i32
    %c0_i32_1 = arith.constant 0 : i32
    return %c0_i32, %c0_i32_0 : i32, i32
  }
  func.func @transform_9(%arg0: i32) -> (i32, i32) {
    %c0_i32 = arith.constant 0 : i32
    %c0_i32_0 = arith.constant 0 : i32
    return %c0_i32, %arg0 : i32, i32
  }
}

</mosaic_0001>

<bundles_post_ra>
// kernel: value_only_nn_forward.1
= control target key start
LH: loop header
LB: loop body
LE: loop exit
PB: predicated region body
PF: predicated region fallthrough
CT: control target
= control target key end

     0   :  { %14 = vsyncpa [#allocation3], 0  ;;  %s637_s30 = smov [#allocation2]   ;;  %s762_s0 = inlined_call_operand.vmem [shape: f32[8,32], index: 0, kind: input, shape index: {}]   ;;  %s763_s1 = inlined_call_operand.vmem [shape: bf16[32,256], index: 1, kind: input, shape index: {}]   ;;  %s764_s2 = inlined_call_operand.vmem [shape: f32[1,256], index: 2, kind: input, shape index: {}]   ;;  %s765_s3 = inlined_call_operand.hbm [shape: bf16[256,128], index: 3, kind: input, shape index: {}]   ;;  %s766_s4 = inlined_call_operand.vmem [shape: f32[1,128], index: 4, kind: input, shape index: {}]   ;;  %s767_s5 = inlined_call_operand.vmem [shape: bf16[128,64], index: 5, kind: input, shape index: {}]   ;;  %s768_s6 = inlined_call_operand.vmem [shape: f32[1,64], index: 6, kind: input, shape index: {}]   ;;  %s769_s7 = inlined_call_operand.vmem [shape: bf16[8,64], index: 7, kind: input, shape index: {}]   ;;  %s770_s8 = inlined_call_operand.vmem [shape: f32[8,1], index: 8, kind: input, shape index: {}]   ;;  %s771_s9 = inlined_call_operand.vmem [shape: f32[8,8], index: 9, kind: output, shape index: {}]  }
   0x1   :  { %s26_s10 = sshll.u32 %s637_s30, 4  ;;  %s613_s13 = scalar_lea.hbm %s765_s3, 2048  ;;  %s27_s10 = int_to_ptr.vmem [resolvable:$true] %s26_s10 }
   0x2   :  { %p614_p0 = scmp.ne.s32.totalorder %s765_s3, %s613_s13  ;;  %p617_p1 = scmp.lt.u32.totalorder %s613_s13, %s765_s3 }
   0x4   :  { %p619_p2 = pnand %p617_p1, %p614_p0 }
   0x6   :  { %622 = shalt.err (!%p619_p2)
}
   0x7   :  { %s623_s18 = scalar_lea.vmem %s27_s10, 2048  ;;  %p628_p4 = scmp.lt.s32.totalorder %s27_s10, %s27_s10 }
   0x8   :  { %p624_p3 = scmp.ne.s32.totalorder %s27_s10, %s623_s18  ;;  %p629_p5 = scmp.lt.s32.totalorder %s623_s18, %s623_s18 }
   0xa   :  { %p630_p6 = por %p629_p5, %p628_p4 }
   0xc   :  { %p631_p7 = pnand %p630_p6, %p624_p3 }
   0xe   :  { %634 = shalt.err (!%p631_p7)
}
   0xf   :  { %s638_s19 = smov 64   ;;  %s639_s20 = smov 4  }
  0x10   :  { %32 = dma.hbm_to_vmem [thread:$0]  %s765_s3, 2048, %s27_s10, [#allocation3], %s638_s19, %s638_s19, %s639_s20  }
  0x11   :  { %635 = dma.done.wait [#allocation3], 2048  }
  0x12   :  { %636 = vsyncadd [#allocation3], 4294965248  ;;  %v640_v0 = vmov 0   ;;  %v583_v1 = vld [vmem:[%s763_s1 + $0x4] ss:$8 sps:$4 sm:$0xff]   ;;  %vm85_vm0 = vcmask 261120   ;;  %v55_v30 = vlaneseq }
  0x13   :  { %121 = vmatprep.mubr.bf16.mxu0 %v640_v0  ;;  %582 = vset.pattern.permute.xlu0 %v640_v0  ;;  %v585_v2 = vld [vmem:[%s763_s1] ss:$8 sps:$4 sm:$0xff]   ;;  %v586_v3 = vld [vmem:[%s763_s1 + $0x14] ss:$8 sps:$4 sm:$0xff]   ;;  %v588_v4 = vld [vmem:[%s763_s1 + $0x10] ss:$8 sps:$4 sm:$0xff]  }
  0x14   :  { %89 = vmatprep.subr.bf16.mxu0 %v583_v1  ;;  %v47_v5 = vld [vmem:[%s762_s0] sm:$0xff]  ;;  %v591_v8 = vld [vmem:[#allocation2 + $0x48] sm:$0xff]   ;;  %v593_v11 = vld [vmem:[#allocation2 + $0x50] sm:$0xff]   ;;  %v641_v24 = vmov 0.0   ;;  %v56_v31 = vshrl.u32 %v55_v30, 7  ;;  %vm642_vm1 = vmmov 0  }
  0x15   :  { %90 = vmatpush1.bf16.msra.mxu0 %v585_v2  ;;  %v589_v6 = vld [vmem:[#allocation2 + $0x40] sm:$0xff]   ;;  %v48_v9 = vpack.c.bf16 %v47_v5, %v47_v5  ;;  %v592_v10 = vld [vmem:[#allocation2 + $0x8] sm:$0xff]   ;;  %v594_v12 = vld [vmem:[#allocation2 + $0x10] sm:$0xff]   ;;  %vm431_vm2 = vcmask 523264   ;;  %vm478_vm3 = vcmask 64512  }
  0x16   :  { %91 = vmatprep.subr.bf16.mxu0 %v586_v3  ;;  %v590_v7 = vld [vmem:[#allocation2] sm:$0xff]   ;;  %517 = vmatprep.subr.bf16.mxu1 %v589_v6  ;;  %v595_v13 = vld [vmem:[#allocation2 + $0x58] sm:$0xff]   ;;  %v599_v17 = vld [vmem:[#allocation2 + $0x68] sm:$0xff]   ;;  %v57_v32 = vsub.s32 0, %v56_v31  ;;  %v61_v34 = vsub.s32 1, %v56_v31 }
  0x17   :  { %518 = vmatpush3.bf16.msra.mxu1 %v590_v7  ;;  %v596_v14 = vld [vmem:[#allocation2 + $0x18] sm:$0xff]   ;;  %v597_v15 = vld [vmem:[#allocation2 + $0x60] sm:$0xff]   ;;  %v600_v18 = vld [vmem:[#allocation2 + $0x28] sm:$0xff]  }
  0x18   :  { %519 = vmatprep.subr.bf16.mxu1 %v591_v8  ;;  %v598_v16 = vld [vmem:[#allocation2 + $0x20] sm:$0xff]   ;;  %v601_v19 = vld [vmem:[#allocation2 + $0x70] sm:$0xff]   ;;  %v603_v21 = vld [vmem:[#allocation2 + $0x78] sm:$0xff]  }
  0x19   :  { %92 = vmatpush1.bf16.msra.mxu0 %v588_v4  ;;  %v602_v20 = vld [vmem:[#allocation2 + $0x30] sm:$0xff]   ;;  %v604_v22 = vld [vmem:[#allocation2 + $0x38] sm:$0xff]   ;;  %v605_v23 = vld [vmem:[%s767_s5] sm:$0xff]  }
  0x1a   :  { %550 = vmatprep.subr.bf16.mxu0 %v641_v24  ;;  %v606_v25 = vld [vmem:[%s767_s5 + $0x8] sm:$0xff]   ;;  %v607_v26 = vld [vmem:[%s767_s5 + $0x10] sm:$0xff]   ;;  %v608_v27 = vld [vmem:[%s767_s5 + $0x18] sm:$0xff]  }
  0x1b   :  { %520 = vmatpush3.bf16.msra.mxu1 %v592_v10  ;;  %v609_v28 = vld [vmem:[%s767_s5 + $0x20] sm:$0xff]   ;;  %v610_v29 = vld [vmem:[%s767_s5 + $0x28] sm:$0xff]   ;;  %v611_v47 = vld [vmem:[%s767_s5 + $0x30] sm:$0xff]  }
  0x1c   :  { %489 = vmatmul.mubr.msk.bf16.vlgmr.msra.gmra.mrb[0].mxu0 %vm85_vm0, %v48_v9  ;;  %521 = vmatprep.subr.bf16.mxu1 %v593_v11  ;;  %v53_v33 = vld [vmem:[%s764_s2] sm:$0x3]  ;;  %v612_v48 = vld [vmem:[%s767_s5 + $0x38] sm:$0xff]  }
  0x1d   :  { %551 = vmatpush3.bf16.msra.mxu0 %v605_v23  ;;  %v58_v35 = vrot.slane %v53_v33, %v57_v32  ;;  %v62_v36 = vrot.slane %v53_v33, %v61_v34  ;;  %566 = vmatprep.mubr.msk.bf16.mxu0 %vm642_vm1, %v641_v24  ;;  %v490_v50 = vld [vmem:[%s766_s4] ss:$0 sm:$0xff] }
  0x1e   :  { %552 = vmatprep.subr.bf16.mxu0 %v641_v24  ;;  %v425_v58 = vld [vmem:[%s770_s8] sm:$0xff] }
  0x1f   :  { %522 = vmatpush3.bf16.msra.mxu1 %v594_v12  ;;  %428 = vperm.xlu0 %582, %v425_v58   ;;  %v507_v59 = vld [vmem:[%s768_s6] ss:$0 sm:$0xff] }
  0x20   :  { %523 = vmatprep.subr.bf16.mxu1 %v595_v13  ;;  %v423_v4 = vld [vmem:[%s769_s7] sm:$0xf] }
  0x21   :  { %553 = vmatpush3.bf16.msra.mxu0 %v606_v25 }
  0x22   :  { %554 = vmatprep.subr.bf16.mxu0 %v641_v24 }
  0x23   :  { %524 = vmatpush3.bf16.msra.mxu1 %v596_v14 }
  0x24   :  { %525 = vmatprep.subr.bf16.mxu1 %v597_v15 }
  0x25   :  { %555 = vmatpush3.bf16.msra.mxu0 %v607_v26 }
  0x26   :  { %556 = vmatprep.subr.bf16.mxu0 %v641_v24 }
  0x27   :  { %526 = vmatpush3.bf16.msra.mxu1 %v598_v16 }
  0x28   :  { %527 = vmatprep.subr.bf16.mxu1 %v599_v17 }
  0x29   :  { %557 = vmatpush3.bf16.msra.mxu0 %v608_v27 }
  0x2a   :  { %558 = vmatprep.subr.bf16.mxu0 %v641_v24 }
  0x2b   :  { %528 = vmatpush3.bf16.msra.mxu1 %v600_v18 }
  0x2c   :  { %529 = vmatprep.subr.bf16.mxu1 %v601_v19 }
  0x2d   :  { %559 = vmatpush3.bf16.msra.mxu0 %v609_v28 }
  0x2e   :  { %560 = vmatprep.subr.bf16.mxu0 %v641_v24 }
  0x2f   :  { %530 = vmatpush3.bf16.msra.mxu1 %v602_v20 }
  0x30   :  { %531 = vmatprep.subr.bf16.mxu1 %v603_v21 }
  0x31   :  { %561 = vmatpush3.bf16.msra.mxu0 %v610_v29 }
  0x32   :  { %562 = vmatprep.subr.bf16.mxu0 %v641_v24 }
  0x33   :  { %532 = vmatpush3.bf16.msra.mxu1 %v604_v22 }
  0x34   :  { %570 = vmatprep.subr.bf16.mxu1 %v641_v24 }
  0x35   :  { %563 = vmatpush3.bf16.msra.mxu0 %v611_v47 }
  0x36   :  { %564 = vmatprep.subr.bf16.mxu0 %v641_v24 }
  0x39   :  { %565 = vmatpush3.bf16.msra.mxu0 %v612_v48 }
  0x9e   :  { %v429_v5 = vpop.permute.xlu0 %428 }
  0xef   :  { %v123_v37 = vpop.f32.mrb[0].mxu0 }
  0xf0   :  { %v124_v38 = vadd.f32 %v123_v37, %v58_v35  ;;  %v125_v39 = vpop.f32.mrb[1].mxu0 }
  0xf1   :  { %v126_v40 = vadd.f32 %v125_v39, %v62_v36  ;;  %v127_v41 = vpop.f32.mrb[2].mxu0 }
  0xf2   :  { %v130_v42 = vmax.f32 %v124_v38, 0.0  ;;  %v128_v43 = vpop.f32.mrb[3].mxu0 }
  0xf3   :  { %v131_v44 = vmax.f32 %v126_v40, 0.0 }
  0xf4   :  { %v132_v46 = vpack.c.bf16 %v130_v42, %v130_v42 }
  0xf5   :  { %v133_v45 = vpack.c.bf16 %v131_v44, %v131_v44 }
  0xf7   :  { %301 = vmatprep.mubr.bf16.mxu1 %v133_v45 }
  0xf8   :  { %302 = vmatmul.mubr.bf16.vlgmr.msra.gmra.mrb[0].mxu1 %v132_v46 }
  0xf9   :  { %572 = vmatprep.mubr.msk.bf16.mxu1 %vm642_vm1, %v641_v24 }
 0x1cb   :  { %v533_v49 = vpop.f32.mrb[0].mxu1 }
 0x1cc   :  { %v534_v51 = vpop.f32.mrb[1].mxu1 }
 0x1cd   :  { %v535_v52 = vadd.f32 %v534_v51, %v533_v49  ;;  %v536_v53 = vpop.f32.mrb[2].mxu1 }
 0x1ce   :  { %v537_v54 = vpop.f32.mrb[3].mxu1 }
 0x1cf   :  { %v304_v55 = vadd.f32 %v535_v52, %v490_v50 }
 0x1d1   :  { %v309_v56 = vmax.f32 %v304_v55, 0.0 }
 0x1d3   :  { %v310_v57 = vpack.c.bf16 %v309_v56, %v309_v56 }
 0x1d5   :  { %567 = vmatmul.mubr.bf16.vlgmr.msra.gmra.mrb[4].mxu0 %v310_v57 }
 0x2a8   :  { %v416_v60 = vpop.f32.mrb[4].mxu0 }
 0x2a9   :  { %v417_v61 = vadd.f32 %v507_v59, %v416_v60  ;;  %v568_v62 = vpop.f32.mrb[5].mxu0 }
 0x2aa   :  { %v419_v63 = vpop.f32.mrb[6].mxu0 }
 0x2ab   :  { %v422_v0 = vmax.f32 %v417_v61, 0.0  ;;  %v569_v1 = vpop.f32.mrb[7].mxu0 }
 0x2ad   :  { %v424_v2 = vpack.c.bf16 %v422_v0, %v422_v0 }
 0x2af   :  { %v436_v3 = vsel %vm431_vm2, %v424_v2, 0 }
 0x2b0   :  { %571 = vmatpush3.bf16.xpose.msra.mxu1 %v436_v3 }
 0x2b7   :  { %573 = vmatmul.mubr.msk.bf16.vlgmr.msra.gmra.mrb[4].mxu1 %vm431_vm2, %v423_v4 }
 0x38a   :  { %v472_v6 = vpop.f32.mrb[4].mxu1 }
 0x38b   :  { %v473_v7 = vadd.f32 %v472_v6, %v429_v5  ;;  %v574_v8 = vpop.f32.mrb[5].mxu1 }
 0x38c   :  { %v475_v9 = vpop.f32.mrb[6].mxu1 }
 0x38d   :  { %479 = vst.msk [vmem:[%s771_s9] sm:$0xff] %vm478_vm3, %v473_v7  ;;  %v575_v10 = vpop.f32.mrb[7].mxu1 }
 0x38e   :  { %484 = vsyncpa [#allocation3], 1 }

</bundles_post_ra>
